<compile_context>
chip_gen: v6e
topology: v6e:2x2x1
jax: 0.10.0
libtpu: 0.0.40
codegen_flags: <defaults>
</compile_context>

<pallas_src>
import functools

import jax
import jax.numpy as jnp
from jax import lax
from jax.experimental import pallas as pl
from jax.experimental.pallas import tpu as pltpu

_EXPERT_SUBLANES = 8  # experts padded to one sublane group


def _round_up(x: int, m: int) -> int:
    return ((x + m - 1) // m) * m


def bias_experts_kernel(x_ref, wt_ref, b_ref, pred_ref, conf_ref):
    # x_ref : [TB, H]    batch tile of embeddings (streamed over the grid)
    # wt_ref: [E8, H]    per-expert weights, pre-transposed, E padded to 8
    # b_ref : [E8, 1]    per-expert biases
    # outputs are expert-major / batch-lane-dense: [E8, TB]
    logits = lax.dot_general(
        wt_ref[...], x_ref[...],
        dimension_numbers=(((1,), (1,)), ((), ())),  # contract H with H -> [E8, TB]
        preferred_element_type=jnp.float32,
    )
    logits = logits + b_ref[...]  # bias broadcast over batch lanes

    # Numerically stable sigmoid: exp and approx reciprocal both issue on EUP.
    e = jnp.exp(-jnp.abs(logits))
    r = pl.reciprocal(1.0 + e, approx=True)
    conf = jnp.where(logits >= 0.0, r, e * r)

    conf_ref[...] = conf.astype(conf_ref.dtype)
    pred_ref[...] = (logits > 0.0).astype(pred_ref.dtype)


def prepare_expert_params(w, b):
    """One-time parameter prep: transpose W, pad experts to 8 sublanes, cast f32.

    w: [H, E], b: [1, E] or [E]  ->  (wt [E8, H] f32, bp [E8, 1] f32)
    """
    H, E = w.shape
    e_pad = _round_up(max(E, 1), _EXPERT_SUBLANES)
    wt = jnp.zeros((e_pad, H), jnp.float32).at[:E, :].set(
        jnp.asarray(w, jnp.float32).T)
    bp = jnp.zeros((e_pad, 1), jnp.float32).at[:E, 0].set(
        jnp.asarray(b, jnp.float32).reshape(-1))
    return wt, bp


@functools.partial(jax.jit, static_argnames=("num_experts", "block_b"))
def bias_experts_forward(x, wt, bp, *, num_experts, block_b=1024):
    """x: [B, H], wt: [E8, H], bp: [E8, 1] -> (pred [B, E] i32, conf [B, E] f32)."""
    B, H = x.shape
    e_pad, Hw = wt.shape
    assert H == Hw and num_experts <= e_pad

    # Cap the batch tile so double-buffered x stays well inside scoped VMEM
    # (v7x has only 64 MiB physical / 32 MiB default-scoped VMEM).
    bytes_per_row = H * x.dtype.itemsize
    tb_cap = max(128, ((8 << 20) // (2 * bytes_per_row)) // 128 * 128)
    block_b = min(block_b, tb_cap)

    if B > 256:
        # >= 2 lane-aligned grid steps so both v7x TensorCores get work.
        TB = min(block_b, _round_up(pl.cdiv(B, 2), 128))
    else:
        TB = B  # single full-extent block (always a legal block shape)
    grid = (pl.cdiv(B, TB),)

    pred_t, conf_t = pl.pallas_call(
        bias_experts_kernel,
        out_shape=(
            jax.ShapeDtypeStruct((e_pad, B), jnp.int32),    # predictions
            jax.ShapeDtypeStruct((e_pad, B), jnp.float32),  # confidences
        ),
        grid=grid,
        in_specs=[
            pl.BlockSpec((TB, H), lambda i: (i, 0)),       # x streamed over batch
            pl.BlockSpec((e_pad, H), lambda i: (0, 0)),    # W^T resident across grid
            pl.BlockSpec((e_pad, 1), lambda i: (0, 0)),    # b resident across grid
        ],
        out_specs=(
            pl.BlockSpec((e_pad, TB), lambda i: (0, i)),
            pl.BlockSpec((e_pad, TB), lambda i: (0, i)),
        ),
        compiler_params=pltpu.CompilerParams(
            dimension_semantics=("parallel",),             # shard batch across TCs (v7x)
            vmem_limit_bytes=32 * 1024 * 1024,
        ),
    )(x, wt, bp)

    pred = pred_t[:num_experts, :].T   # [B, E]
    conf = conf_t[:num_experts, :].T   # [B, E]
    return pred, conf


if __name__ == "__main__":
    # Small deterministic setup:
    #   B = 8 "texts" (batch), H = 128 embedding dim,
    #   E = 4 experts (llm_zero_shot / llm_few_shot / llm_CoT / default).
    B, H, E = 8, 128, 4

    key = jax.random.PRNGKey(0)
    kx, kw, kb = jax.random.split(key, 3)

    x = jax.random.normal(kx, (B, H), dtype=jnp.float32)          # text embeddings
    w = jax.random.normal(kw, (H, E), dtype=jnp.float32) * 0.1    # per-expert weights
    b = jax.random.normal(kb, (1, E), dtype=jnp.float32) * 0.1    # per-expert biases

    wt, bp = prepare_expert_params(w, b)                          # done once (weights)
    pred, conf = bias_experts_forward(x, wt, bp, num_experts=E)
    jax.block_until_ready((pred, conf))

    # Pure-JAX f32 reference.
    logits_ref = x @ w + b
    conf_ref = jax.nn.sigmoid(logits_ref)
    pred_ref = (logits_ref > 0).astype(jnp.int32)

    assert pred.shape == (B, E) and conf.shape == (B, E)
    assert jnp.allclose(conf, conf_ref, atol=5e-3, rtol=5e-3), "confidence mismatch"
    near_boundary = jnp.abs(logits_ref) < 5e-3  # ignore sign flips from matmul rounding at the decision boundary
    assert bool(jnp.all((pred == pred_ref) | near_boundary)), "prediction mismatch"

    print("KERNEL_OK")
</pallas_src>

<mosaic_0001>
module attributes {stable_mosaic.version = 11 : i64} {
  func.func @bias_experts_kernel(%arg0: i32, %arg1: memref<8x128xf32, #tpu.memory_space<vmem>>, %arg2: memref<8x128xf32, #tpu.memory_space<vmem>>, %arg3: memref<8x1xf32, #tpu.memory_space<vmem>>, %arg4: memref<8x8xi32, #tpu.memory_space<vmem>>, %arg5: memref<8x8xf32, #tpu.memory_space<vmem>>) attributes {dimension_semantics = [#tpu.dimension_semantics<parallel>], iteration_bounds = array<i64: 1>, scalar_prefetch = 0 : i64, scratch_operands = 0 : i64, tpu.core_type = #tpu.core_type<tc>, window_params = [{transform_indices = @transform_0, window_bounds = array<i64: 8, 128>}, {pipeline_mode = #tpu.pipeline_mode<synchronous>, transform_indices = @transform_1, window_bounds = array<i64: 8, 128>}, {pipeline_mode = #tpu.pipeline_mode<synchronous>, transform_indices = @transform_2, window_bounds = array<i64: 8, 1>}, {transform_indices = @transform_3, window_bounds = array<i64: 8, 8>}, {transform_indices = @transform_4, window_bounds = array<i64: 8, 8>}]} {
    %c0 = arith.constant 0 : index
    %c0_0 = arith.constant 0 : index
    %0 = vector.load %arg2[%c0, %c0_0] : memref<8x128xf32, #tpu.memory_space<vmem>>, vector<8x128xf32>
    %c0_1 = arith.constant 0 : index
    %c0_2 = arith.constant 0 : index
    %1 = vector.load %arg1[%c0_1, %c0_2] : memref<8x128xf32, #tpu.memory_space<vmem>>, vector<8x128xf32>
    %cst = arith.constant dense<0.000000e+00> : vector<8x8xf32>
    %2 = tpu.matmul %0, %1, %cst {dimension_numbers = #tpu.dot_dimension_numbers<[1], [1], [0], [0], [0, 0, 1, 0], [], []>} : vector<8x128xf32>, vector<8x128xf32>, vector<8x8xf32> -> vector<8x8xf32>
    %c0_3 = arith.constant 0 : index
    %c0_4 = arith.constant 0 : index
    %3 = vector.load %arg3[%c0_3, %c0_4] : memref<8x1xf32, #tpu.memory_space<vmem>>, vector<8x1xf32>
    %4 = vector.broadcast %3 : vector<8x1xf32> to vector<8x8xf32>
    %5 = arith.addf %2, %4 : vector<8x8xf32>
    %6 = math.absf %5 : vector<8x8xf32>
    %cst_5 = arith.constant 0.000000e+00 : f32
    %7 = vector.broadcast %cst_5 : f32 to vector<8x8xf32>
    %8 = arith.subf %7, %6 : vector<8x8xf32>
    %9 = math.exp %8 : vector<8x8xf32>
    %cst_6 = arith.constant 1.000000e+00 : f32
    %10 = vector.broadcast %cst_6 : f32 to vector<8x8xf32>
    %11 = arith.addf %10, %9 : vector<8x8xf32>
    %12 = tpu.reciprocal %11 {approx = true} : vector<8x8xf32> -> vector<8x8xf32>
    %cst_7 = arith.constant 0.000000e+00 : f32
    %13 = vector.broadcast %cst_7 : f32 to vector<8x8xf32>
    %14 = arith.cmpf oge, %5, %13 : vector<8x8xf32>
    %15 = arith.mulf %9, %12 : vector<8x8xf32>
    %16 = arith.select %14, %12, %15 : vector<8x8xi1>, vector<8x8xf32>
    %c0_8 = arith.constant 0 : index
    %c0_9 = arith.constant 0 : index
    %17 = vector.load %arg5[%c0_8, %c0_9] : memref<8x8xf32, #tpu.memory_space<vmem>>, vector<8x8xf32>
    tpu.vector_store %arg5[%c0_8, %c0_9], %16 {strides = array<i32>} : memref<8x8xf32, #tpu.memory_space<vmem>>, vector<8x8xf32>,
    %cst_10 = arith.constant 0.000000e+00 : f32
    %18 = vector.broadcast %cst_10 : f32 to vector<8x8xf32>
    %19 = arith.cmpf ogt, %5, %18 : vector<8x8xf32>
    %20 = arith.extui %19 : vector<8x8xi1> to vector<8x8xi32>
    %c0_11 = arith.constant 0 : index
    %c0_12 = arith.constant 0 : index
    %21 = vector.load %arg4[%c0_11, %c0_12] : memref<8x8xi32, #tpu.memory_space<vmem>>, vector<8x8xi32>
    tpu.vector_store %arg4[%c0_11, %c0_12], %20 {strides = array<i32>} : memref<8x8xi32, #tpu.memory_space<vmem>>, vector<8x8xi32>,
    return
  }
  func.func @transform_0(%arg0: i32) -> (i32, i32) {
    %c0_i32 = arith.constant 0 : i32
    %c0_i32_0 = arith.constant 0 : i32
    return %arg0, %c0_i32 : i32, i32
  }
  func.func @transform_1(%arg0: i32) -> (i32, i32) {
    %c0_i32 = arith.constant 0 : i32
    %c0_i32_0 = arith.constant 0 : i32
    %c0_i32_1 = arith.constant 0 : i32
    return %c0_i32, %c0_i32_0 : i32, i32
  }
  func.func @transform_2(%arg0: i32) -> (i32, i32) {
    %c0_i32 = arith.constant 0 : i32
    %c0_i32_0 = arith.constant 0 : i32
    %c0_i32_1 = arith.constant 0 : i32
    return %c0_i32, %c0_i32_0 : i32, i32
  }
  func.func @transform_3(%arg0: i32) -> (i32, i32) {
    %c0_i32 = arith.constant 0 : i32
    %c0_i32_0 = arith.constant 0 : i32
    return %c0_i32, %arg0 : i32, i32
  }
  func.func @transform_4(%arg0: i32) -> (i32, i32) {
    %c0_i32 = arith.constant 0 : i32
    %c0_i32_0 = arith.constant 0 : i32
    return %c0_i32, %arg0 : i32, i32
  }
}

</mosaic_0001>

<bundles_post_ra>
// kernel: bias_experts_forward.1
= control target key start
LH: loop header
LB: loop body
LE: loop exit
PB: predicated region body
PF: predicated region fallthrough
CT: control target
= control target key end

     0   :  { %10 = vsyncpa [#allocation3], 0  ;;  %s167_s15 = smov [#allocation2]   ;;  %s213_s0 = inlined_call_operand.vmem [shape: f32[8,128], index: 0, kind: input, shape index: {}]   ;;  %s214_s1 = inlined_call_operand.hbm [shape: f32[8,128], index: 1, kind: input, shape index: {}]   ;;  %s215_s2 = inlined_call_operand.vmem [shape: f32[8,1], index: 2, kind: input, shape index: {}]   ;;  %s216_s3 = inlined_call_operand.vmem [shape: s32[8,8], index: 3, kind: output, shape index: {0}]   ;;  %s217_s4 = inlined_call_operand.vmem [shape: f32[8,8], index: 4, kind: output, shape index: {1}]  }
   0x1   :  { %s19_s16 = sshll.u32 %s167_s15, 4  ;;  %s20_s16 = int_to_ptr.vmem [resolvable:$true] %s19_s16 }
   0x2   :  { %s153_s17 = scalar_lea.vmem %s20_s16, 128  ;;  %p158_p1 = scmp.lt.s32.totalorder %s20_s16, %s20_s16 }
   0x3   :  { %p154_p0 = scmp.ne.s32.totalorder %s20_s16, %s153_s17  ;;  %p159_p2 = scmp.lt.s32.totalorder %s153_s17, %s153_s17 }
   0x5   :  { %p160_p3 = por %p159_p2, %p158_p1 }
   0x7   :  { %p161_p4 = pnand %p160_p3, %p154_p0 }
   0x9   :  { %164 = shalt.err (!%p161_p4)
}
   0xa   :  { %22 = dma.hbm_to_vmem [thread:$0]  %s214_s1, 128, %s20_s16, [#allocation3]  }
   0xb   :  { %165 = dma.done.wait [#allocation3], 128  }
   0xc   :  { %166 = vsyncadd [#allocation3], 4294967168  ;;  %v168_v0 = vmov 0.0   ;;  %vm169_vm0 = vmmov 0   ;;  %v170_v1 = vmov 0   ;;  %v29_v2 = vld [vmem:[%s213_s0] sm:$0xff] }
   0xd   :  { %131 = vmatprep.subr.mxu0 %v168_v0  ;;  %133 = vmatprep.mubr.msk.f32.mxu0 %vm169_vm0, %v168_v0  ;;  %v30_v3 = vld [vmem:[%s215_s2] sm:$0xff]  ;;  %vm115_vm1 = vcmask 64512  }
   0xe   :  { %140 = vset.pattern.permute.xlu0 %v170_v1  ;;  %132 = vmatpush3.xpose.msra.mxu0 %v29_v2  ;;  %v28_v4 = vld [vmem:[#allocation2] sm:$0xff] }
   0xf   :  { %33 = vperm.xlu0 %140, %v30_v3  }
  0x11   :  { %134 = vmatmul.mubr.f32.vlgmr.msra.gmra.mxu0 %v28_v4 }
  0x8a   :  { %v34_v5 = vpop.permute.xlu0 %33 }
  0xd1   :  { %v102_v6 = vpop.f32.mrf.mxu0 }
  0xd2   :  { %v103_v7 = vadd.f32 %v102_v6, %v34_v5 }
  0xd3   :  { %v135_v8 = vpop.f32.mrf.mxu0 }
  0xd4   :  { %v106_v9 = vand.u32 2147483647, %v103_v7  ;;  %vm117_vm2 = vcmp.gt.f32.partialorder %v103_v7, 0.0  ;;  %vm112_vm3 = vcmp.ge.f32.partialorder %v103_v7, 0.0 }
  0xd5   :  { %v118_v10 = vsel %vm117_vm2, 1, %v170_v1 }
  0xd6   :  { %v107_v11 = vsub.f32 0.0, %v106_v9  ;;  %119 = vst.msk [vmem:[%s216_s3] sm:$0xff] %vm115_vm1, %v118_v10 }
  0xd8   :  { %v108_v12 = vmul.f32 1.442695, %v107_v11 }
  0xda   :  { %141 = vpow2.f32 %v108_v12 }
  0xe7   :  { %v142_v13 = vpop.eup %141 }
  0xe8   :  { %v110_v14 = vadd.f32 1.0, %v142_v13 }
  0xea   :  { %143 = vrcp.f32 %v110_v14 }
  0xf7   :  { %v144_v15 = vpop.eup %143 }
  0xf8   :  { %v113_v16 = vmul.f32 %v144_v15, %v142_v13 }
  0xfa   :  { %v114_v17 = vsel %vm112_vm3, %v144_v15, %v113_v16 }
  0xfb   :  { %116 = vst.msk [vmem:[%s217_s4] sm:$0xff] %vm115_vm1, %v114_v17 }
  0xfc   :  { %128 = vsyncpa [#allocation3], 1 }

</bundles_post_ra>
